<compile_context>
chip_gen: v7x
topology: tpu7x:2x2x1
jax: 0.10.0
libtpu: 0.0.40
codegen_flags: <defaults>
</compile_context>

<pallas_src>
import math

import jax
import jax.numpy as jnp
from jax import lax
from jax.experimental import pallas as pl
from jax.experimental.pallas import tpu as pltpu


def _round_up(x: int, m: int) -> int:
    return (x + m - 1) // m * m


def _cdiv(a: int, b: int) -> int:
    return -(-a // b)


def _make_gather_kernel(tile_tokens: int, vocab: int, scale: float,
                        window: int = 8):
    """Kernel: gather `tile_tokens` embedding rows from HBM, scale, store."""
    window = max(1, min(window, tile_tokens))

    def kernel(ids_ref, table_ref, o_ref, buf_ref, sem):
        # ids_ref  : SMEM (num_tiles * tile_tokens,) int32   (scalar prefetch)
        # table_ref: HBM  (vocab, d_model)                   (pl.ANY, manual DMA)
        # o_ref    : VMEM (tile_tokens, d_model) output tile
        # buf_ref  : VMEM (tile_tokens, d_model) gather scratch
        # sem      : one DMA semaphore shared by every row copy
        base = pl.program_id(0) * tile_tokens

        def row_copy(j, tok):
            return pltpu.make_async_copy(
                table_ref.at[pl.ds(tok, 1), :],
                buf_ref.at[pl.ds(j, 1), :],
                sem)

        def start_row(j):
            tok = ids_ref[base + j]
            # Clamp: an id >= vocab would otherwise be an unchecked OOB gather.
            tok = jnp.clip(tok, 0, vocab - 1)
            row_copy(j, tok).start()

        def wait_row():
            # All row copies have identical size and share `sem`, so waiting on
            # any same-shaped descriptor retires one outstanding row copy.
            row_copy(0, 0).wait()

        # Prime the window: `window` row gathers in flight.
        def prime(j, c):
            start_row(j)
            return c
        lax.fori_loop(0, window, prime, 0, unroll=True)

        # Steady state: retire one row, issue the next (keeps `window` in flight).
        def steady(j, c):
            wait_row()
            start_row(j)
            return c
        lax.fori_loop(window, tile_tokens, steady, 0, unroll=8)

        # Drain the window.
        def drain(j, c):
            wait_row()
            return c
        lax.fori_loop(0, window, drain, 0, unroll=True)

        # One dense, full-tile scale + store (scale applied once, in f32).
        o_ref[...] = (buf_ref[...].astype(jnp.float32) * scale).astype(o_ref.dtype)

    return kernel


def input_embedding(token_ids, table, *, tile_tokens=None):
    """Forward of InputEmbedding: table[token_ids] * sqrt(d_model).

    token_ids: integer array of any shape (e.g. [B, S]).
    table    : [vocab_size, d_model] embedding weights.
    returns  : token_ids.shape + (d_model,), dtype = table.dtype.
    """
    vocab, d_model = table.shape
    orig_shape = token_ids.shape
    ids_flat = token_ids.reshape(-1).astype(jnp.int32)
    n_tokens = int(ids_flat.shape[0])
    itemsize = jnp.dtype(table.dtype).itemsize

    # SMEM footprint of the scalar-prefetched ids: 1D int32[N] pads to
    # next_pow2(4N) bytes.  TODO(synk): chunk ids per grid step for longer runs.
    assert n_tokens <= 32768, "chunk token ids for very long sequences"

    # Output rows: only round up to the 8-row sublane granularity (no tile-
    # sized padding => no wrapper-side copy of the whole output).
    n_rows_out = _round_up(n_tokens, 8)

    if tile_tokens is None:
        # Size token tiles so double-buffered output tiles + the gather scratch
        # stay within ~16 MiB -> safe on v5e/v6e (128 MiB) and v7x (64 MiB/TC),
        # while still large enough (up to 1024 rows) to amortize the ~0.35 us
        # per-grid-step pipeline overhead.
        bytes_per_token = d_model * itemsize * 3       # 2x out (dbl-buf) + buf
        budget = 16 << 20
        tile_tokens = max(8, min(1024, budget // max(1, bytes_per_token)))
    tile_tokens = int(tile_tokens)
    tile_tokens = min(tile_tokens, n_rows_out)
    tile_tokens = max(8, (tile_tokens // 8) * 8)

    num_tiles = _cdiv(n_rows_out, tile_tokens)

    # Pad the ids (with valid token 0) so every scalar read in every tile is in
    # bounds; the corresponding output rows are masked off by the partial-block
    # writeback / the final slice below.
    padded_ids = num_tiles * tile_tokens
    if padded_ids != n_tokens:
        ids_flat = jnp.pad(ids_flat, (0, padded_ids - n_tokens))

    scale = float(math.sqrt(d_model))
    kernel = _make_gather_kernel(tile_tokens, int(vocab), scale, window=8)

    out_tile_bytes = tile_tokens * d_model * itemsize
    buf_bytes = tile_tokens * d_model * itemsize
    vmem_limit = int(min(max(buf_bytes + 2 * out_tile_bytes + (2 << 20),
                             8 << 20), 32 << 20))

    grid_spec = pltpu.PrefetchScalarGridSpec(
        num_scalar_prefetch=1,
        grid=(num_tiles,),
        in_specs=[
            # Embedding table stays in HBM; rows are DMA-gathered manually.
            pl.BlockSpec(memory_space=pl.ANY),
        ],
        out_specs=pl.BlockSpec((tile_tokens, d_model), lambda i, ids: (i, 0)),
        scratch_shapes=[
            pltpu.VMEM((tile_tokens, d_model), table.dtype),  # gather buffer
            pltpu.SemaphoreType.DMA,                          # shared row-DMA sem
        ],
    )

    out = pl.pallas_call(
        kernel,
        out_shape=jax.ShapeDtypeStruct((n_rows_out, d_model), table.dtype),
        grid_spec=grid_spec,
        compiler_params=pltpu.CompilerParams(
            dimension_semantics=("parallel",),   # independent tiles -> megacore
            vmem_limit_bytes=vmem_limit,
        ),
    )(ids_flat, table)

    if n_rows_out != n_tokens:          # at most 7 extra rows, ragged case only
        out = out[:n_tokens]
    return out.reshape(*orig_shape, d_model)


if __name__ == "__main__":
    B, S = 2, 8
    vocab_size, d_model = 64, 32

    key = jax.random.PRNGKey(0)
    k_ids, k_tab, k_ids2 = jax.random.split(key, 3)
    token_ids = jax.random.randint(k_ids, (B, S), 0, vocab_size, dtype=jnp.int32)
    table = jax.random.normal(k_tab, (vocab_size, d_model), dtype=jnp.float32)

    out = input_embedding(token_ids, table)
    jax.block_until_ready(out)

    ref = table[token_ids] * math.sqrt(d_model)
    assert out.shape == (B, S, d_model)
    assert bool(jnp.all(jnp.isfinite(out)))
    assert jnp.allclose(out, ref, atol=1e-5, rtol=1e-5), "mismatch vs reference"

    # Ragged, multi-tile case: exercises the steady-state DMA window, id
    # padding and partial output blocks.
    token_ids2 = jax.random.randint(k_ids2, (3, 7), 0, vocab_size, dtype=jnp.int32)
    out2 = input_embedding(token_ids2, table, tile_tokens=16)
    jax.block_until_ready(out2)
    ref2 = table[token_ids2] * math.sqrt(d_model)
    assert out2.shape == (3, 7, d_model)
    assert jnp.allclose(out2, ref2, atol=1e-5, rtol=1e-5), "mismatch (ragged)"

    print("KERNEL_OK")
</pallas_src>

<mosaic_0001>
module attributes {stable_mosaic.version = 11 : i64} {
  func.func @kernel(%arg0: i32, %arg1: memref<16xi32, #tpu.memory_space<smem>>, %arg2: memref<64x32xf32, #tpu.memory_space<any>>, %arg3: memref<16x32xf32, #tpu.memory_space<vmem>>, %arg4: memref<16x32xf32, #tpu.memory_space<vmem>>, %arg5: memref<!tpu.dma_semaphore, #tpu.memory_space<semaphore_mem>>) attributes {dimension_semantics = [#tpu.dimension_semantics<parallel>], iteration_bounds = array<i64: 1>, scalar_prefetch = 1 : i64, scratch_operands = 2 : i64, tpu.core_type = #tpu.core_type<tc>, window_params = [{}, {transform_indices = @transform_1, window_bounds = array<i64: 16, 32>}]} {
    %c16_i32 = arith.constant 16 : i32
    %0 = arith.muli %arg0, %c16_i32 : i32
    %c0_i32 = arith.constant 0 : i32
    %1 = arith.addi %0, %c0_i32 : i32
    %2 = arith.index_cast %1 : i32 to index
    %3 = memref.load %arg1[%2] : memref<16xi32, #tpu.memory_space<smem>>
    %c0_i32_0 = arith.constant 0 : i32
    %c63_i32 = arith.constant 63 : i32
    %4 = arith.maxsi %c0_i32_0, %3 : i32
    %5 = arith.minsi %c63_i32, %4 : i32
    %c0_i32_1 = arith.constant 0 : i32
    %6 = tpu.memref_slice %arg2[%5, %c0_i32_1] : memref<64x32xf32, #tpu.memory_space<any>> -> memref<1x32xf32, #tpu.memory_space<any>>
    %c0_i32_2 = arith.constant 0 : i32
    %7 = tpu.memref_slice %arg4[%c0_i32, %c0_i32_2] : memref<16x32xf32, #tpu.memory_space<vmem>> -> memref<1x32xf32, #tpu.memory_space<vmem>>
    tpu.enqueue_dma source(%6 : memref<1x32xf32, #tpu.memory_space<any>>) target(%7 : memref<1x32xf32, #tpu.memory_space<vmem>>) target_semaphore(%arg5 : memref<!tpu.dma_semaphore, #tpu.memory_space<semaphore_mem>>)
    %c1_i32 = arith.constant 1 : i32
    %8 = arith.addi %0, %c1_i32 : i32
    %9 = arith.index_cast %8 : i32 to index
    %10 = memref.load %arg1[%9] : memref<16xi32, #tpu.memory_space<smem>>
    %c0_i32_3 = arith.constant 0 : i32
    %c63_i32_4 = arith.constant 63 : i32
    %11 = arith.maxsi %c0_i32_3, %10 : i32
    %12 = arith.minsi %c63_i32_4, %11 : i32
    %c0_i32_5 = arith.constant 0 : i32
    %13 = tpu.memref_slice %arg2[%12, %c0_i32_5] : memref<64x32xf32, #tpu.memory_space<any>> -> memref<1x32xf32, #tpu.memory_space<any>>
    %c0_i32_6 = arith.constant 0 : i32
    %14 = tpu.memref_slice %arg4[%c1_i32, %c0_i32_6] : memref<16x32xf32, #tpu.memory_space<vmem>> -> memref<1x32xf32, #tpu.memory_space<vmem>>
    tpu.enqueue_dma source(%13 : memref<1x32xf32, #tpu.memory_space<any>>) target(%14 : memref<1x32xf32, #tpu.memory_space<vmem>>) target_semaphore(%arg5 : memref<!tpu.dma_semaphore, #tpu.memory_space<semaphore_mem>>)
    %c2_i32 = arith.constant 2 : i32
    %15 = arith.addi %0, %c2_i32 : i32
    %16 = arith.index_cast %15 : i32 to index
    %17 = memref.load %arg1[%16] : memref<16xi32, #tpu.memory_space<smem>>
    %c0_i32_7 = arith.constant 0 : i32
    %c63_i32_8 = arith.constant 63 : i32
    %18 = arith.maxsi %c0_i32_7, %17 : i32
    %19 = arith.minsi %c63_i32_8, %18 : i32
    %c0_i32_9 = arith.constant 0 : i32
    %20 = tpu.memref_slice %arg2[%19, %c0_i32_9] : memref<64x32xf32, #tpu.memory_space<any>> -> memref<1x32xf32, #tpu.memory_space<any>>
    %c0_i32_10 = arith.constant 0 : i32
    %21 = tpu.memref_slice %arg4[%c2_i32, %c0_i32_10] : memref<16x32xf32, #tpu.memory_space<vmem>> -> memref<1x32xf32, #tpu.memory_space<vmem>>
    tpu.enqueue_dma source(%20 : memref<1x32xf32, #tpu.memory_space<any>>) target(%21 : memref<1x32xf32, #tpu.memory_space<vmem>>) target_semaphore(%arg5 : memref<!tpu.dma_semaphore, #tpu.memory_space<semaphore_mem>>)
    %c3_i32 = arith.constant 3 : i32
    %22 = arith.addi %0, %c3_i32 : i32
    %23 = arith.index_cast %22 : i32 to index
    %24 = memref.load %arg1[%23] : memref<16xi32, #tpu.memory_space<smem>>
    %c0_i32_11 = arith.constant 0 : i32
    %c63_i32_12 = arith.constant 63 : i32
    %25 = arith.maxsi %c0_i32_11, %24 : i32
    %26 = arith.minsi %c63_i32_12, %25 : i32
    %c0_i32_13 = arith.constant 0 : i32
    %27 = tpu.memref_slice %arg2[%26, %c0_i32_13] : memref<64x32xf32, #tpu.memory_space<any>> -> memref<1x32xf32, #tpu.memory_space<any>>
    %c0_i32_14 = arith.constant 0 : i32
    %28 = tpu.memref_slice %arg4[%c3_i32, %c0_i32_14] : memref<16x32xf32, #tpu.memory_space<vmem>> -> memref<1x32xf32, #tpu.memory_space<vmem>>
    tpu.enqueue_dma source(%27 : memref<1x32xf32, #tpu.memory_space<any>>) target(%28 : memref<1x32xf32, #tpu.memory_space<vmem>>) target_semaphore(%arg5 : memref<!tpu.dma_semaphore, #tpu.memory_space<semaphore_mem>>)
    %c4_i32 = arith.constant 4 : i32
    %29 = arith.addi %0, %c4_i32 : i32
    %30 = arith.index_cast %29 : i32 to index
    %31 = memref.load %arg1[%30] : memref<16xi32, #tpu.memory_space<smem>>
    %c0_i32_15 = arith.constant 0 : i32
    %c63_i32_16 = arith.constant 63 : i32
    %32 = arith.maxsi %c0_i32_15, %31 : i32
    %33 = arith.minsi %c63_i32_16, %32 : i32
    %c0_i32_17 = arith.constant 0 : i32
    %34 = tpu.memref_slice %arg2[%33, %c0_i32_17] : memref<64x32xf32, #tpu.memory_space<any>> -> memref<1x32xf32, #tpu.memory_space<any>>
    %c0_i32_18 = arith.constant 0 : i32
    %35 = tpu.memref_slice %arg4[%c4_i32, %c0_i32_18] : memref<16x32xf32, #tpu.memory_space<vmem>> -> memref<1x32xf32, #tpu.memory_space<vmem>>
    tpu.enqueue_dma source(%34 : memref<1x32xf32, #tpu.memory_space<any>>) target(%35 : memref<1x32xf32, #tpu.memory_space<vmem>>) target_semaphore(%arg5 : memref<!tpu.dma_semaphore, #tpu.memory_space<semaphore_mem>>)
    %c5_i32 = arith.constant 5 : i32
    %36 = arith.addi %0, %c5_i32 : i32
    %37 = arith.index_cast %36 : i32 to index
    %38 = memref.load %arg1[%37] : memref<16xi32, #tpu.memory_space<smem>>
    %c0_i32_19 = arith.constant 0 : i32
    %c63_i32_20 = arith.constant 63 : i32
    %39 = arith.maxsi %c0_i32_19, %38 : i32
    %40 = arith.minsi %c63_i32_20, %39 : i32
    %c0_i32_21 = arith.constant 0 : i32
    %41 = tpu.memref_slice %arg2[%40, %c0_i32_21] : memref<64x32xf32, #tpu.memory_space<any>> -> memref<1x32xf32, #tpu.memory_space<any>>
    %c0_i32_22 = arith.constant 0 : i32
    %42 = tpu.memref_slice %arg4[%c5_i32, %c0_i32_22] : memref<16x32xf32, #tpu.memory_space<vmem>> -> memref<1x32xf32, #tpu.memory_space<vmem>>
    tpu.enqueue_dma source(%41 : memref<1x32xf32, #tpu.memory_space<any>>) target(%42 : memref<1x32xf32, #tpu.memory_space<vmem>>) target_semaphore(%arg5 : memref<!tpu.dma_semaphore, #tpu.memory_space<semaphore_mem>>)
    %c6_i32 = arith.constant 6 : i32
    %43 = arith.addi %0, %c6_i32 : i32
    %44 = arith.index_cast %43 : i32 to index
    %45 = memref.load %arg1[%44] : memref<16xi32, #tpu.memory_space<smem>>
    %c0_i32_23 = arith.constant 0 : i32
    %c63_i32_24 = arith.constant 63 : i32
    %46 = arith.maxsi %c0_i32_23, %45 : i32
    %47 = arith.minsi %c63_i32_24, %46 : i32
    %c0_i32_25 = arith.constant 0 : i32
    %48 = tpu.memref_slice %arg2[%47, %c0_i32_25] : memref<64x32xf32, #tpu.memory_space<any>> -> memref<1x32xf32, #tpu.memory_space<any>>
    %c0_i32_26 = arith.constant 0 : i32
    %49 = tpu.memref_slice %arg4[%c6_i32, %c0_i32_26] : memref<16x32xf32, #tpu.memory_space<vmem>> -> memref<1x32xf32, #tpu.memory_space<vmem>>
    tpu.enqueue_dma source(%48 : memref<1x32xf32, #tpu.memory_space<any>>) target(%49 : memref<1x32xf32, #tpu.memory_space<vmem>>) target_semaphore(%arg5 : memref<!tpu.dma_semaphore, #tpu.memory_space<semaphore_mem>>)
    %c7_i32 = arith.constant 7 : i32
    %50 = arith.addi %0, %c7_i32 : i32
    %51 = arith.index_cast %50 : i32 to index
    %52 = memref.load %arg1[%51] : memref<16xi32, #tpu.memory_space<smem>>
    %c0_i32_27 = arith.constant 0 : i32
    %c63_i32_28 = arith.constant 63 : i32
    %53 = arith.maxsi %c0_i32_27, %52 : i32
    %54 = arith.minsi %c63_i32_28, %53 : i32
    %c0_i32_29 = arith.constant 0 : i32
    %55 = tpu.memref_slice %arg2[%54, %c0_i32_29] : memref<64x32xf32, #tpu.memory_space<any>> -> memref<1x32xf32, #tpu.memory_space<any>>
    %c0_i32_30 = arith.constant 0 : i32
    %56 = tpu.memref_slice %arg4[%c7_i32, %c0_i32_30] : memref<16x32xf32, #tpu.memory_space<vmem>> -> memref<1x32xf32, #tpu.memory_space<vmem>>
    tpu.enqueue_dma source(%55 : memref<1x32xf32, #tpu.memory_space<any>>) target(%56 : memref<1x32xf32, #tpu.memory_space<vmem>>) target_semaphore(%arg5 : memref<!tpu.dma_semaphore, #tpu.memory_space<semaphore_mem>>)
    %c8_i32 = arith.constant 8 : i32
    %c8_i32_31 = arith.constant 8 : i32
    %c0_i32_32 = arith.constant 0 : i32
    %c0_i32_33 = arith.constant 0 : i32
    %57 = tpu.memref_slice %arg2[%c0_i32_32, %c0_i32_33] : memref<64x32xf32, #tpu.memory_space<any>> -> memref<1x32xf32, #tpu.memory_space<any>>
    %c0_i32_34 = arith.constant 0 : i32
    %c0_i32_35 = arith.constant 0 : i32
    %58 = tpu.memref_slice %arg4[%c0_i32_34, %c0_i32_35] : memref<16x32xf32, #tpu.memory_space<vmem>> -> memref<1x32xf32, #tpu.memory_space<vmem>>
    tpu.wait_dma2 semaphore(%arg5 : memref<!tpu.dma_semaphore, #tpu.memory_space<semaphore_mem>>) src(%57 : memref<1x32xf32, #tpu.memory_space<any>>) dst(%58 : memref<1x32xf32, #tpu.memory_space<vmem>>)
    %59 = arith.addi %0, %c8_i32_31 : i32
    %60 = arith.index_cast %59 : i32 to index
    %61 = memref.load %arg1[%60] : memref<16xi32, #tpu.memory_space<smem>>
    %c0_i32_36 = arith.constant 0 : i32
    %c63_i32_37 = arith.constant 63 : i32
    %62 = arith.maxsi %c0_i32_36, %61 : i32
    %63 = arith.minsi %c63_i32_37, %62 : i32
    %c0_i32_38 = arith.constant 0 : i32
    %64 = tpu.memref_slice %arg2[%63, %c0_i32_38] : memref<64x32xf32, #tpu.memory_space<any>> -> memref<1x32xf32, #tpu.memory_space<any>>
    %c0_i32_39 = arith.constant 0 : i32
    %65 = tpu.memref_slice %arg4[%c8_i32_31, %c0_i32_39] : memref<16x32xf32, #tpu.memory_space<vmem>> -> memref<1x32xf32, #tpu.memory_space<vmem>>
    tpu.enqueue_dma source(%64 : memref<1x32xf32, #tpu.memory_space<any>>) target(%65 : memref<1x32xf32, #tpu.memory_space<vmem>>) target_semaphore(%arg5 : memref<!tpu.dma_semaphore, #tpu.memory_space<semaphore_mem>>)
    %c9_i32 = arith.constant 9 : i32
    %c0_i32_40 = arith.constant 0 : i32
    %c0_i32_41 = arith.constant 0 : i32
    %66 = tpu.memref_slice %arg2[%c0_i32_40, %c0_i32_41] : memref<64x32xf32, #tpu.memory_space<any>> -> memref<1x32xf32, #tpu.memory_space<any>>
    %c0_i32_42 = arith.constant 0 : i32
    %c0_i32_43 = arith.constant 0 : i32
    %67 = tpu.memref_slice %arg4[%c0_i32_42, %c0_i32_43] : memref<16x32xf32, #tpu.memory_space<vmem>> -> memref<1x32xf32, #tpu.memory_space<vmem>>
    tpu.wait_dma2 semaphore(%arg5 : memref<!tpu.dma_semaphore, #tpu.memory_space<semaphore_mem>>) src(%66 : memref<1x32xf32, #tpu.memory_space<any>>) dst(%67 : memref<1x32xf32, #tpu.memory_space<vmem>>)
    %68 = arith.addi %0, %c9_i32 : i32
    %69 = arith.index_cast %68 : i32 to index
    %70 = memref.load %arg1[%69] : memref<16xi32, #tpu.memory_space<smem>>
    %c0_i32_44 = arith.constant 0 : i32
    %c63_i32_45 = arith.constant 63 : i32
    %71 = arith.maxsi %c0_i32_44, %70 : i32
    %72 = arith.minsi %c63_i32_45, %71 : i32
    %c0_i32_46 = arith.constant 0 : i32
    %73 = tpu.memref_slice %arg2[%72, %c0_i32_46] : memref<64x32xf32, #tpu.memory_space<any>> -> memref<1x32xf32, #tpu.memory_space<any>>
    %c0_i32_47 = arith.constant 0 : i32
    %74 = tpu.memref_slice %arg4[%c9_i32, %c0_i32_47] : memref<16x32xf32, #tpu.memory_space<vmem>> -> memref<1x32xf32, #tpu.memory_space<vmem>>
    tpu.enqueue_dma source(%73 : memref<1x32xf32, #tpu.memory_space<any>>) target(%74 : memref<1x32xf32, #tpu.memory_space<vmem>>) target_semaphore(%arg5 : memref<!tpu.dma_semaphore, #tpu.memory_space<semaphore_mem>>)
    %c10_i32 = arith.constant 10 : i32
    %c0_i32_48 = arith.constant 0 : i32
    %c0_i32_49 = arith.constant 0 : i32
    %75 = tpu.memref_slice %arg2[%c0_i32_48, %c0_i32_49] : memref<64x32xf32, #tpu.memory_space<any>> -> memref<1x32xf32, #tpu.memory_space<any>>
    %c0_i32_50 = arith.constant 0 : i32
    %c0_i32_51 = arith.constant 0 : i32
    %76 = tpu.memref_slice %arg4[%c0_i32_50, %c0_i32_51] : memref<16x32xf32, #tpu.memory_space<vmem>> -> memref<1x32xf32, #tpu.memory_space<vmem>>
    tpu.wait_dma2 semaphore(%arg5 : memref<!tpu.dma_semaphore, #tpu.memory_space<semaphore_mem>>) src(%75 : memref<1x32xf32, #tpu.memory_space<any>>) dst(%76 : memref<1x32xf32, #tpu.memory_space<vmem>>)
    %77 = arith.addi %0, %c10_i32 : i32
    %78 = arith.index_cast %77 : i32 to index
    %79 = memref.load %arg1[%78] : memref<16xi32, #tpu.memory_space<smem>>
    %c0_i32_52 = arith.constant 0 : i32
    %c63_i32_53 = arith.constant 63 : i32
    %80 = arith.maxsi %c0_i32_52, %79 : i32
    %81 = arith.minsi %c63_i32_53, %80 : i32
    %c0_i32_54 = arith.constant 0 : i32
    %82 = tpu.memref_slice %arg2[%81, %c0_i32_54] : memref<64x32xf32, #tpu.memory_space<any>> -> memref<1x32xf32, #tpu.memory_space<any>>
    %c0_i32_55 = arith.constant 0 : i32
    %83 = tpu.memref_slice %arg4[%c10_i32, %c0_i32_55] : memref<16x32xf32, #tpu.memory_space<vmem>> -> memref<1x32xf32, #tpu.memory_space<vmem>>
    tpu.enqueue_dma source(%82 : memref<1x32xf32, #tpu.memory_space<any>>) target(%83 : memref<1x32xf32, #tpu.memory_space<vmem>>) target_semaphore(%arg5 : memref<!tpu.dma_semaphore, #tpu.memory_space<semaphore_mem>>)
    %c11_i32 = arith.constant 11 : i32
    %c0_i32_56 = arith.constant 0 : i32
    %c0_i32_57 = arith.constant 0 : i32
    %84 = tpu.memref_slice %arg2[%c0_i32_56, %c0_i32_57] : memref<64x32xf32, #tpu.memory_space<any>> -> memref<1x32xf32, #tpu.memory_space<any>>
    %c0_i32_58 = arith.constant 0 : i32
    %c0_i32_59 = arith.constant 0 : i32
    %85 = tpu.memref_slice %arg4[%c0_i32_58, %c0_i32_59] : memref<16x32xf32, #tpu.memory_space<vmem>> -> memref<1x32xf32, #tpu.memory_space<vmem>>
    tpu.wait_dma2 semaphore(%arg5 : memref<!tpu.dma_semaphore, #tpu.memory_space<semaphore_mem>>) src(%84 : memref<1x32xf32, #tpu.memory_space<any>>) dst(%85 : memref<1x32xf32, #tpu.memory_space<vmem>>)
    %86 = arith.addi %0, %c11_i32 : i32
    %87 = arith.index_cast %86 : i32 to index
    %88 = memref.load %arg1[%87] : memref<16xi32, #tpu.memory_space<smem>>
    %c0_i32_60 = arith.constant 0 : i32
    %c63_i32_61 = arith.constant 63 : i32
    %89 = arith.maxsi %c0_i32_60, %88 : i32
    %90 = arith.minsi %c63_i32_61, %89 : i32
    %c0_i32_62 = arith.constant 0 : i32
    %91 = tpu.memref_slice %arg2[%90, %c0_i32_62] : memref<64x32xf32, #tpu.memory_space<any>> -> memref<1x32xf32, #tpu.memory_space<any>>
    %c0_i32_63 = arith.constant 0 : i32
    %92 = tpu.memref_slice %arg4[%c11_i32, %c0_i32_63] : memref<16x32xf32, #tpu.memory_space<vmem>> -> memref<1x32xf32, #tpu.memory_space<vmem>>
    tpu.enqueue_dma source(%91 : memref<1x32xf32, #tpu.memory_space<any>>) target(%92 : memref<1x32xf32, #tpu.memory_space<vmem>>) target_semaphore(%arg5 : memref<!tpu.dma_semaphore, #tpu.memory_space<semaphore_mem>>)
    %c12_i32 = arith.constant 12 : i32
    %c0_i32_64 = arith.constant 0 : i32
    %c0_i32_65 = arith.constant 0 : i32
    %93 = tpu.memref_slice %arg2[%c0_i32_64, %c0_i32_65] : memref<64x32xf32, #tpu.memory_space<any>> -> memref<1x32xf32, #tpu.memory_space<any>>
    %c0_i32_66 = arith.constant 0 : i32
    %c0_i32_67 = arith.constant 0 : i32
    %94 = tpu.memref_slice %arg4[%c0_i32_66, %c0_i32_67] : memref<16x32xf32, #tpu.memory_space<vmem>> -> memref<1x32xf32, #tpu.memory_space<vmem>>
    tpu.wait_dma2 semaphore(%arg5 : memref<!tpu.dma_semaphore, #tpu.memory_space<semaphore_mem>>) src(%93 : memref<1x32xf32, #tpu.memory_space<any>>) dst(%94 : memref<1x32xf32, #tpu.memory_space<vmem>>)
    %95 = arith.addi %0, %c12_i32 : i32
    %96 = arith.index_cast %95 : i32 to index
    %97 = memref.load %arg1[%96] : memref<16xi32, #tpu.memory_space<smem>>
    %c0_i32_68 = arith.constant 0 : i32
    %c63_i32_69 = arith.constant 63 : i32
    %98 = arith.maxsi %c0_i32_68, %97 : i32
    %99 = arith.minsi %c63_i32_69, %98 : i32
    %c0_i32_70 = arith.constant 0 : i32
    %100 = tpu.memref_slice %arg2[%99, %c0_i32_70] : memref<64x32xf32, #tpu.memory_space<any>> -> memref<1x32xf32, #tpu.memory_space<any>>
    %c0_i32_71 = arith.constant 0 : i32
    %101 = tpu.memref_slice %arg4[%c12_i32, %c0_i32_71] : memref<16x32xf32, #tpu.memory_space<vmem>> -> memref<1x32xf32, #tpu.memory_space<vmem>>
    tpu.enqueue_dma source(%100 : memref<1x32xf32, #tpu.memory_space<any>>) target(%101 : memref<1x32xf32, #tpu.memory_space<vmem>>) target_semaphore(%arg5 : memref<!tpu.dma_semaphore, #tpu.memory_space<semaphore_mem>>)
    %c13_i32 = arith.constant 13 : i32
    %c0_i32_72 = arith.constant 0 : i32
    %c0_i32_73 = arith.constant 0 : i32
    %102 = tpu.memref_slice %arg2[%c0_i32_72, %c0_i32_73] : memref<64x32xf32, #tpu.memory_space<any>> -> memref<1x32xf32, #tpu.memory_space<any>>
    %c0_i32_74 = arith.constant 0 : i32
    %c0_i32_75 = arith.constant 0 : i32
    %103 = tpu.memref_slice %arg4[%c0_i32_74, %c0_i32_75] : memref<16x32xf32, #tpu.memory_space<vmem>> -> memref<1x32xf32, #tpu.memory_space<vmem>>
    tpu.wait_dma2 semaphore(%arg5 : memref<!tpu.dma_semaphore, #tpu.memory_space<semaphore_mem>>) src(%102 : memref<1x32xf32, #tpu.memory_space<any>>) dst(%103 : memref<1x32xf32, #tpu.memory_space<vmem>>)
    %104 = arith.addi %0, %c13_i32 : i32
    %105 = arith.index_cast %104 : i32 to index
    %106 = memref.load %arg1[%105] : memref<16xi32, #tpu.memory_space<smem>>
    %c0_i32_76 = arith.constant 0 : i32
    %c63_i32_77 = arith.constant 63 : i32
    %107 = arith.maxsi %c0_i32_76, %106 : i32
    %108 = arith.minsi %c63_i32_77, %107 : i32
    %c0_i32_78 = arith.constant 0 : i32
    %109 = tpu.memref_slice %arg2[%108, %c0_i32_78] : memref<64x32xf32, #tpu.memory_space<any>> -> memref<1x32xf32, #tpu.memory_space<any>>
    %c0_i32_79 = arith.constant 0 : i32
    %110 = tpu.memref_slice %arg4[%c13_i32, %c0_i32_79] : memref<16x32xf32, #tpu.memory_space<vmem>> -> memref<1x32xf32, #tpu.memory_space<vmem>>
    tpu.enqueue_dma source(%109 : memref<1x32xf32, #tpu.memory_space<any>>) target(%110 : memref<1x32xf32, #tpu.memory_space<vmem>>) target_semaphore(%arg5 : memref<!tpu.dma_semaphore, #tpu.memory_space<semaphore_mem>>)
    %c14_i32 = arith.constant 14 : i32
    %c0_i32_80 = arith.constant 0 : i32
    %c0_i32_81 = arith.constant 0 : i32
    %111 = tpu.memref_slice %arg2[%c0_i32_80, %c0_i32_81] : memref<64x32xf32, #tpu.memory_space<any>> -> memref<1x32xf32, #tpu.memory_space<any>>
    %c0_i32_82 = arith.constant 0 : i32
    %c0_i32_83 = arith.constant 0 : i32
    %112 = tpu.memref_slice %arg4[%c0_i32_82, %c0_i32_83] : memref<16x32xf32, #tpu.memory_space<vmem>> -> memref<1x32xf32, #tpu.memory_space<vmem>>
    tpu.wait_dma2 semaphore(%arg5 : memref<!tpu.dma_semaphore, #tpu.memory_space<semaphore_mem>>) src(%111 : memref<1x32xf32, #tpu.memory_space<any>>) dst(%112 : memref<1x32xf32, #tpu.memory_space<vmem>>)
    %113 = arith.addi %0, %c14_i32 : i32
    %114 = arith.index_cast %113 : i32 to index
    %115 = memref.load %arg1[%114] : memref<16xi32, #tpu.memory_space<smem>>
    %c0_i32_84 = arith.constant 0 : i32
    %c63_i32_85 = arith.constant 63 : i32
    %116 = arith.maxsi %c0_i32_84, %115 : i32
    %117 = arith.minsi %c63_i32_85, %116 : i32
    %c0_i32_86 = arith.constant 0 : i32
    %118 = tpu.memref_slice %arg2[%117, %c0_i32_86] : memref<64x32xf32, #tpu.memory_space<any>> -> memref<1x32xf32, #tpu.memory_space<any>>
    %c0_i32_87 = arith.constant 0 : i32
    %119 = tpu.memref_slice %arg4[%c14_i32, %c0_i32_87] : memref<16x32xf32, #tpu.memory_space<vmem>> -> memref<1x32xf32, #tpu.memory_space<vmem>>
    tpu.enqueue_dma source(%118 : memref<1x32xf32, #tpu.memory_space<any>>) target(%119 : memref<1x32xf32, #tpu.memory_space<vmem>>) target_semaphore(%arg5 : memref<!tpu.dma_semaphore, #tpu.memory_space<semaphore_mem>>)
    %c15_i32 = arith.constant 15 : i32
    %c0_i32_88 = arith.constant 0 : i32
    %c0_i32_89 = arith.constant 0 : i32
    %120 = tpu.memref_slice %arg2[%c0_i32_88, %c0_i32_89] : memref<64x32xf32, #tpu.memory_space<any>> -> memref<1x32xf32, #tpu.memory_space<any>>
    %c0_i32_90 = arith.constant 0 : i32
    %c0_i32_91 = arith.constant 0 : i32
    %121 = tpu.memref_slice %arg4[%c0_i32_90, %c0_i32_91] : memref<16x32xf32, #tpu.memory_space<vmem>> -> memref<1x32xf32, #tpu.memory_space<vmem>>
    tpu.wait_dma2 semaphore(%arg5 : memref<!tpu.dma_semaphore, #tpu.memory_space<semaphore_mem>>) src(%120 : memref<1x32xf32, #tpu.memory_space<any>>) dst(%121 : memref<1x32xf32, #tpu.memory_space<vmem>>)
    %122 = arith.addi %0, %c15_i32 : i32
    %123 = arith.index_cast %122 : i32 to index
    %124 = memref.load %arg1[%123] : memref<16xi32, #tpu.memory_space<smem>>
    %c0_i32_92 = arith.constant 0 : i32
    %c63_i32_93 = arith.constant 63 : i32
    %125 = arith.maxsi %c0_i32_92, %124 : i32
    %126 = arith.minsi %c63_i32_93, %125 : i32
    %c0_i32_94 = arith.constant 0 : i32
    %127 = tpu.memref_slice %arg2[%126, %c0_i32_94] : memref<64x32xf32, #tpu.memory_space<any>> -> memref<1x32xf32, #tpu.memory_space<any>>
    %c0_i32_95 = arith.constant 0 : i32
    %128 = tpu.memref_slice %arg4[%c15_i32, %c0_i32_95] : memref<16x32xf32, #tpu.memory_space<vmem>> -> memref<1x32xf32, #tpu.memory_space<vmem>>
    tpu.enqueue_dma source(%127 : memref<1x32xf32, #tpu.memory_space<any>>) target(%128 : memref<1x32xf32, #tpu.memory_space<vmem>>) target_semaphore(%arg5 : memref<!tpu.dma_semaphore, #tpu.memory_space<semaphore_mem>>)
    %c8_i32_96 = arith.constant 8 : i32
    %c0_i32_97 = arith.constant 0 : i32
    %c0_i32_98 = arith.constant 0 : i32
    %c0_i32_99 = arith.constant 0 : i32
    %129 = tpu.memref_slice %arg2[%c0_i32_98, %c0_i32_99] : memref<64x32xf32, #tpu.memory_space<any>> -> memref<1x32xf32, #tpu.memory_space<any>>
    %c0_i32_100 = arith.constant 0 : i32
    %c0_i32_101 = arith.constant 0 : i32
    %130 = tpu.memref_slice %arg4[%c0_i32_100, %c0_i32_101] : memref<16x32xf32, #tpu.memory_space<vmem>> -> memref<1x32xf32, #tpu.memory_space<vmem>>
    tpu.wait_dma2 semaphore(%arg5 : memref<!tpu.dma_semaphore, #tpu.memory_space<semaphore_mem>>) src(%129 : memref<1x32xf32, #tpu.memory_space<any>>) dst(%130 : memref<1x32xf32, #tpu.memory_space<vmem>>)
    %c1_i32_102 = arith.constant 1 : i32
    %c0_i32_103 = arith.constant 0 : i32
    %c0_i32_104 = arith.constant 0 : i32
    %131 = tpu.memref_slice %arg2[%c0_i32_103, %c0_i32_104] : memref<64x32xf32, #tpu.memory_space<any>> -> memref<1x32xf32, #tpu.memory_space<any>>
    %c0_i32_105 = arith.constant 0 : i32
    %c0_i32_106 = arith.constant 0 : i32
    %132 = tpu.memref_slice %arg4[%c0_i32_105, %c0_i32_106] : memref<16x32xf32, #tpu.memory_space<vmem>> -> memref<1x32xf32, #tpu.memory_space<vmem>>
    tpu.wait_dma2 semaphore(%arg5 : memref<!tpu.dma_semaphore, #tpu.memory_space<semaphore_mem>>) src(%131 : memref<1x32xf32, #tpu.memory_space<any>>) dst(%132 : memref<1x32xf32, #tpu.memory_space<vmem>>)
    %c2_i32_107 = arith.constant 2 : i32
    %c0_i32_108 = arith.constant 0 : i32
    %c0_i32_109 = arith.constant 0 : i32
    %133 = tpu.memref_slice %arg2[%c0_i32_108, %c0_i32_109] : memref<64x32xf32, #tpu.memory_space<any>> -> memref<1x32xf32, #tpu.memory_space<any>>
    %c0_i32_110 = arith.constant 0 : i32
    %c0_i32_111 = arith.constant 0 : i32
    %134 = tpu.memref_slice %arg4[%c0_i32_110, %c0_i32_111] : memref<16x32xf32, #tpu.memory_space<vmem>> -> memref<1x32xf32, #tpu.memory_space<vmem>>
    tpu.wait_dma2 semaphore(%arg5 : memref<!tpu.dma_semaphore, #tpu.memory_space<semaphore_mem>>) src(%133 : memref<1x32xf32, #tpu.memory_space<any>>) dst(%134 : memref<1x32xf32, #tpu.memory_space<vmem>>)
    %c3_i32_112 = arith.constant 3 : i32
    %c0_i32_113 = arith.constant 0 : i32
    %c0_i32_114 = arith.constant 0 : i32
    %135 = tpu.memref_slice %arg2[%c0_i32_113, %c0_i32_114] : memref<64x32xf32, #tpu.memory_space<any>> -> memref<1x32xf32, #tpu.memory_space<any>>
    %c0_i32_115 = arith.constant 0 : i32
    %c0_i32_116 = arith.constant 0 : i32
    %136 = tpu.memref_slice %arg4[%c0_i32_115, %c0_i32_116] : memref<16x32xf32, #tpu.memory_space<vmem>> -> memref<1x32xf32, #tpu.memory_space<vmem>>
    tpu.wait_dma2 semaphore(%arg5 : memref<!tpu.dma_semaphore, #tpu.memory_space<semaphore_mem>>) src(%135 : memref<1x32xf32, #tpu.memory_space<any>>) dst(%136 : memref<1x32xf32, #tpu.memory_space<vmem>>)
    %c4_i32_117 = arith.constant 4 : i32
    %c0_i32_118 = arith.constant 0 : i32
    %c0_i32_119 = arith.constant 0 : i32
    %137 = tpu.memref_slice %arg2[%c0_i32_118, %c0_i32_119] : memref<64x32xf32, #tpu.memory_space<any>> -> memref<1x32xf32, #tpu.memory_space<any>>
    %c0_i32_120 = arith.constant 0 : i32
    %c0_i32_121 = arith.constant 0 : i32
    %138 = tpu.memref_slice %arg4[%c0_i32_120, %c0_i32_121] : memref<16x32xf32, #tpu.memory_space<vmem>> -> memref<1x32xf32, #tpu.memory_space<vmem>>
    tpu.wait_dma2 semaphore(%arg5 : memref<!tpu.dma_semaphore, #tpu.memory_space<semaphore_mem>>) src(%137 : memref<1x32xf32, #tpu.memory_space<any>>) dst(%138 : memref<1x32xf32, #tpu.memory_space<vmem>>)
    %c5_i32_122 = arith.constant 5 : i32
    %c0_i32_123 = arith.constant 0 : i32
    %c0_i32_124 = arith.constant 0 : i32
    %139 = tpu.memref_slice %arg2[%c0_i32_123, %c0_i32_124] : memref<64x32xf32, #tpu.memory_space<any>> -> memref<1x32xf32, #tpu.memory_space<any>>
    %c0_i32_125 = arith.constant 0 : i32
    %c0_i32_126 = arith.constant 0 : i32
    %140 = tpu.memref_slice %arg4[%c0_i32_125, %c0_i32_126] : memref<16x32xf32, #tpu.memory_space<vmem>> -> memref<1x32xf32, #tpu.memory_space<vmem>>
    tpu.wait_dma2 semaphore(%arg5 : memref<!tpu.dma_semaphore, #tpu.memory_space<semaphore_mem>>) src(%139 : memref<1x32xf32, #tpu.memory_space<any>>) dst(%140 : memref<1x32xf32, #tpu.memory_space<vmem>>)
    %c6_i32_127 = arith.constant 6 : i32
    %c0_i32_128 = arith.constant 0 : i32
    %c0_i32_129 = arith.constant 0 : i32
    %141 = tpu.memref_slice %arg2[%c0_i32_128, %c0_i32_129] : memref<64x32xf32, #tpu.memory_space<any>> -> memref<1x32xf32, #tpu.memory_space<any>>
    %c0_i32_130 = arith.constant 0 : i32
    %c0_i32_131 = arith.constant 0 : i32
    %142 = tpu.memref_slice %arg4[%c0_i32_130, %c0_i32_131] : memref<16x32xf32, #tpu.memory_space<vmem>> -> memref<1x32xf32, #tpu.memory_space<vmem>>
    tpu.wait_dma2 semaphore(%arg5 : memref<!tpu.dma_semaphore, #tpu.memory_space<semaphore_mem>>) src(%141 : memref<1x32xf32, #tpu.memory_space<any>>) dst(%142 : memref<1x32xf32, #tpu.memory_space<vmem>>)
    %c7_i32_132 = arith.constant 7 : i32
    %c0_i32_133 = arith.constant 0 : i32
    %c0_i32_134 = arith.constant 0 : i32
    %143 = tpu.memref_slice %arg2[%c0_i32_133, %c0_i32_134] : memref<64x32xf32, #tpu.memory_space<any>> -> memref<1x32xf32, #tpu.memory_space<any>>
    %c0_i32_135 = arith.constant 0 : i32
    %c0_i32_136 = arith.constant 0 : i32
    %144 = tpu.memref_slice %arg4[%c0_i32_135, %c0_i32_136] : memref<16x32xf32, #tpu.memory_space<vmem>> -> memref<1x32xf32, #tpu.memory_space<vmem>>
    tpu.wait_dma2 semaphore(%arg5 : memref<!tpu.dma_semaphore, #tpu.memory_space<semaphore_mem>>) src(%143 : memref<1x32xf32, #tpu.memory_space<any>>) dst(%144 : memref<1x32xf32, #tpu.memory_space<vmem>>)
    %c0 = arith.constant 0 : index
    %c0_137 = arith.constant 0 : index
    %145 = vector.load %arg4[%c0, %c0_137] : memref<16x32xf32, #tpu.memory_space<vmem>>, vector<16x32xf32>
    %cst = arith.constant 5.65685415 : f32
    %146 = vector.broadcast %cst : f32 to vector<16x32xf32>
    %147 = arith.mulf %145, %146 : vector<16x32xf32>
    %c0_138 = arith.constant 0 : index
    %c0_139 = arith.constant 0 : index
    %148 = vector.load %arg3[%c0_138, %c0_139] : memref<16x32xf32, #tpu.memory_space<vmem>>, vector<16x32xf32>
    tpu.vector_store %arg3[%c0_138, %c0_139], %147 {strides = array<i32>} : memref<16x32xf32, #tpu.memory_space<vmem>>, vector<16x32xf32>,
    return
  }
  func.func @transform_1(%arg0: i32, %arg1: memref<16xi32, #tpu.memory_space<smem>>) -> (i32, i32) {
    %c0_i32 = arith.constant 0 : i32
    %c0_i32_0 = arith.constant 0 : i32
    return %arg0, %c0_i32 : i32, i32
  }
}

</mosaic_0001>

<bundles_post_ra>
// kernel: tpu_custom_call.1
= control target key start
LH: loop header
LB: loop body
LE: loop exit
PB: predicated region body
PF: predicated region fallthrough
CT: control target
= control target key end

     0   :  { %s1368_s0 = inlined_call_operand.vmem [shape: s32[16], index: 0, kind: input, shape index: {}]   ;;  %s1369_s1 = inlined_call_operand.vmem [shape: f32[64,32], index: 1, kind: input, shape index: {}]   ;;  %s1370_s2 = inlined_call_operand.hbm [shape: f32[16,32], index: 2, kind: output, shape index: {}]  }
   0x1   :  { %s7_s11 = sshll.u32 %s1368_s0, 4  ;;  %s8_s11 = int_to_ptr.vmem [resolvable:$true] %s7_s11 }
   0x2   :  { %s1230_s12 = scalar_lea.vmem %s8_s11, 16  ;;  %p1235_p1 = scmp.lt.s32.totalorder %s8_s11, %s8_s11 }
   0x3   :  { %p1231_p0 = scmp.ne.s32.totalorder %s8_s11, %s1230_s12  ;;  %p1236_p2 = scmp.lt.s32.totalorder %s1230_s12, %s1230_s12 }
   0x5   :  { %p1237_p3 = por %p1236_p2, %p1235_p1 }
   0x7   :  { %p1238_p4 = pnand %p1237_p3, %p1231_p0 }
   0x9   :  { %1241 = shalt.err (!%p1238_p4)  }
   0xa   :  { %s1286_s13 = smov [#allocation5]  }
   0xb   :  { %10 = dma.vmem_to_smem %s8_s11, 16, %s1286_s13, [#allocation4] }
   0xc   :  { %1264 = dma.done.wait [#allocation4], 16 }
   0xd   :  { %1265 = vsyncadd [#allocation4], 4294967280 }
   0xe   :  { %12 = sfence }
   0xf   :  { %13 = vsyncpa [#allocation7], 0  ;;  %s15_s14 = sld [smem:[#allocation5]] }
  0x15   :  { %p16_p5 = scmp.gt.s32.totalorder %s15_s14, 0  ;;  %p1098_p6 = scmp.lt.s32.totalorder %s15_s14, 63 }
  0x17   :  { %s1372_s14 = smov (!%p16_p5, %s15_s14), 0 }
  0x18   :  { %s1374_s14 = smov (!%p1098_p6, %s1372_s14), 63 }
  0x19   :  { %s20_s16 = scalar_lea.vmem %s1369_s1, %s1374_s14 }
  0x1a   :  { %v38_v0 = vld [vmem:[%s20_s16] sm:$0x1] }
  0x1b   :  { %39 = vst [vmem:[#allocation2] sm:$0x1] %v38_v0 }
  0x1c   :  { %64 = vsyncadd [#allocation3], 16  ;;  %s1103_s17 = sld [smem:[#allocation5 + $0x1]] }
  0x22   :  { %p67_p7 = scmp.gt.s32.totalorder %s1103_s17, 0  ;;  %p1104_p8 = scmp.lt.s32.totalorder %s1103_s17, 63 }
  0x24   :  { %s1376_s17 = smov (!%p67_p7, %s1103_s17), 0 }
  0x25   :  { %s1378_s17 = smov (!%p1104_p8, %s1376_s17), 63 }
  0x26   :  { %s71_s20 = scalar_lea.vmem %s1369_s1, %s1378_s17 }
  0x27   :  { %v90_v1 = vld [vmem:[%s71_s20] sm:$0x1] }
  0x28   :  { %91 = vst [vmem:[#allocation2 + $0x1] sm:$0x1] %v90_v1 }
  0x29   :  { %116 = vsyncadd [#allocation3], 16  ;;  %s1109_s21 = sld [smem:[#allocation5 + $0x2]] }
  0x2f   :  { %p119_p9 = scmp.gt.s32.totalorder %s1109_s21, 0  ;;  %p1110_p10 = scmp.lt.s32.totalorder %s1109_s21, 63 }
  0x31   :  { %s1380_s21 = smov (!%p119_p9, %s1109_s21), 0 }
  0x32   :  { %s1382_s21 = smov (!%p1110_p10, %s1380_s21), 63 }
  0x33   :  { %s123_s24 = scalar_lea.vmem %s1369_s1, %s1382_s21 }
  0x34   :  { %v142_v2 = vld [vmem:[%s123_s24] sm:$0x1] }
  0x35   :  { %143 = vst [vmem:[#allocation2 + $0x2] sm:$0x1] %v142_v2 }
  0x36   :  { %168 = vsyncadd [#allocation3], 16  ;;  %s1115_s25 = sld [smem:[#allocation5 + $0x3]] }
  0x3c   :  { %p171_p11 = scmp.gt.s32.totalorder %s1115_s25, 0  ;;  %p1116_p12 = scmp.lt.s32.totalorder %s1115_s25, 63 }
  0x3e   :  { %s1384_s25 = smov (!%p171_p11, %s1115_s25), 0 }
  0x3f   :  { %s1386_s25 = smov (!%p1116_p12, %s1384_s25), 63 }
  0x40   :  { %s175_s28 = scalar_lea.vmem %s1369_s1, %s1386_s25 }
  0x41   :  { %v194_v3 = vld [vmem:[%s175_s28] sm:$0x1] }
  0x42   :  { %195 = vst [vmem:[#allocation2 + $0x3] sm:$0x1] %v194_v3 }
  0x43   :  { %220 = vsyncadd [#allocation3], 16  ;;  %s1121_s29 = sld [smem:[#allocation5 + $0x4]] }
  0x49   :  { %p223_p13 = scmp.gt.s32.totalorder %s1121_s29, 0  ;;  %p1122_p0 = scmp.lt.s32.totalorder %s1121_s29, 63 }
  0x4b   :  { %s1388_s29 = smov (!%p223_p13, %s1121_s29), 0 }
  0x4c   :  { %s1390_s29 = smov (!%p1122_p0, %s1388_s29), 63 }
  0x4d   :  { %s227_s4 = scalar_lea.vmem %s1369_s1, %s1390_s29 }
  0x4e   :  { %v246_v4 = vld [vmem:[%s227_s4] sm:$0x1] }
  0x4f   :  { %247 = vst [vmem:[#allocation2 + $0x4] sm:$0x1] %v246_v4 }
  0x50   :  { %272 = vsyncadd [#allocation3], 16  ;;  %s1127_s5 = sld [smem:[#allocation5 + $0x5]] }
  0x56   :  { %p275_p1 = scmp.gt.s32.totalorder %s1127_s5, 0  ;;  %p1128_p2 = scmp.lt.s32.totalorder %s1127_s5, 63 }
  0x58   :  { %s1392_s5 = smov (!%p275_p1, %s1127_s5), 0 }
  0x59   :  { %s1394_s5 = smov (!%p1128_p2, %s1392_s5), 63 }
  0x5a   :  { %s279_s8 = scalar_lea.vmem %s1369_s1, %s1394_s5 }
  0x5b   :  { %v298_v5 = vld [vmem:[%s279_s8] sm:$0x1] }
  0x5c   :  { %299 = vst [vmem:[#allocation2 + $0x5] sm:$0x1] %v298_v5 }
  0x5d   :  { %324 = vsyncadd [#allocation3], 16  ;;  %s1133_s9 = sld [smem:[#allocation5 + $0x6]] }
  0x63   :  { %p327_p3 = scmp.gt.s32.totalorder %s1133_s9, 0  ;;  %p1134_p4 = scmp.lt.s32.totalorder %s1133_s9, 63 }
  0x65   :  { %s1396_s9 = smov (!%p327_p3, %s1133_s9), 0 }
  0x66   :  { %s1398_s9 = smov (!%p1134_p4, %s1396_s9), 63 }
  0x67   :  { %s331_s12 = scalar_lea.vmem %s1369_s1, %s1398_s9 }
  0x68   :  { %v350_v6 = vld [vmem:[%s331_s12] sm:$0x1] }
  0x69   :  { %351 = vst [vmem:[#allocation2 + $0x6] sm:$0x1] %v350_v6 }
  0x6a   :  { %376 = vsyncadd [#allocation3], 16  ;;  %s1139_s13 = sld [smem:[#allocation5 + $0x7]] }
  0x70   :  { %p379_p5 = scmp.gt.s32.totalorder %s1139_s13, 0  ;;  %p1140_p6 = scmp.lt.s32.totalorder %s1139_s13, 63 }
  0x72   :  { %s1400_s13 = smov (!%p379_p5, %s1139_s13), 0 }
  0x73   :  { %s1402_s13 = smov (!%p1140_p6, %s1400_s13), 63 }
  0x74   :  { %s383_s15 = scalar_lea.vmem %s1369_s1, %s1402_s13 }
  0x75   :  { %v402_v7 = vld [vmem:[%s383_s15] sm:$0x1] }
  0x76   :  { %403 = vst [vmem:[#allocation2 + $0x7] sm:$0x1] %v402_v7 }
  0x77   :  { %428 = vsyncadd [#allocation3], 16 }
  0x78   :  { %1266 = dma.done.wait [#allocation3], 16 }
  0x79   :  { %1267 = vsyncadd [#allocation3], 4294967280  ;;  %s1145_s16 = sld [smem:[#allocation5 + $0x8]] }
  0x7f   :  { %p434_p7 = scmp.gt.s32.totalorder %s1145_s16, 0  ;;  %p1146_p8 = scmp.lt.s32.totalorder %s1145_s16, 63 }
  0x81   :  { %s1404_s16 = smov (!%p434_p7, %s1145_s16), 0 }
  0x82   :  { %s1406_s16 = smov (!%p1146_p8, %s1404_s16), 63 }
  0x83   :  { %s438_s19 = scalar_lea.vmem %s1369_s1, %s1406_s16 }
  0x84   :  { %v457_v8 = vld [vmem:[%s438_s19] sm:$0x1] }
  0x85   :  { %458 = vst [vmem:[#allocation2 + $0x8] sm:$0x1] %v457_v8 }
  0x86   :  { %483 = vsyncadd [#allocation3], 16 }
  0x87   :  { %1268 = dma.done.wait [#allocation3], 16 }
  0x88   :  { %1269 = vsyncadd [#allocation3], 4294967280  ;;  %s1151_s20 = sld [smem:[#allocation5 + $0x9]] }
  0x8e   :  { %p488_p9 = scmp.gt.s32.totalorder %s1151_s20, 0  ;;  %p1152_p10 = scmp.lt.s32.totalorder %s1151_s20, 63 }
  0x90   :  { %s1408_s20 = smov (!%p488_p9, %s1151_s20), 0 }
  0x91   :  { %s1410_s20 = smov (!%p1152_p10, %s1408_s20), 63 }
  0x92   :  { %s492_s23 = scalar_lea.vmem %s1369_s1, %s1410_s20 }
  0x93   :  { %v511_v9 = vld [vmem:[%s492_s23] sm:$0x1] }
  0x94   :  { %512 = vst [vmem:[#allocation2 + $0x9] sm:$0x1] %v511_v9 }
  0x95   :  { %537 = vsyncadd [#allocation3], 16 }
  0x96   :  { %1270 = dma.done.wait [#allocation3], 16 }
  0x97   :  { %1271 = vsyncadd [#allocation3], 4294967280  ;;  %s1157_s24 = sld [smem:[#allocation5 + $0xa]] }
  0x9d   :  { %p542_p11 = scmp.gt.s32.totalorder %s1157_s24, 0  ;;  %p1158_p12 = scmp.lt.s32.totalorder %s1157_s24, 63 }
  0x9f   :  { %s1412_s24 = smov (!%p542_p11, %s1157_s24), 0 }
  0xa0   :  { %s1414_s24 = smov (!%p1158_p12, %s1412_s24), 63 }
  0xa1   :  { %s546_s27 = scalar_lea.vmem %s1369_s1, %s1414_s24 }
  0xa2   :  { %v565_v10 = vld [vmem:[%s546_s27] sm:$0x1] }
  0xa3   :  { %566 = vst [vmem:[#allocation2 + $0xa] sm:$0x1] %v565_v10 }
  0xa4   :  { %591 = vsyncadd [#allocation3], 16 }
  0xa5   :  { %1272 = dma.done.wait [#allocation3], 16 }
  0xa6   :  { %1273 = vsyncadd [#allocation3], 4294967280  ;;  %s1163_s28 = sld [smem:[#allocation5 + $0xb]] }
  0xac   :  { %p596_p13 = scmp.gt.s32.totalorder %s1163_s28, 0  ;;  %p1164_p0 = scmp.lt.s32.totalorder %s1163_s28, 63 }
  0xae   :  { %s1416_s28 = smov (!%p596_p13, %s1163_s28), 0 }
  0xaf   :  { %s1418_s28 = smov (!%p1164_p0, %s1416_s28), 63 }
  0xb0   :  { %s600_s3 = scalar_lea.vmem %s1369_s1, %s1418_s28 }
  0xb1   :  { %v619_v11 = vld [vmem:[%s600_s3] sm:$0x1] }
  0xb2   :  { %620 = vst [vmem:[#allocation2 + $0xb] sm:$0x1] %v619_v11 }
  0xb3   :  { %645 = vsyncadd [#allocation3], 16 }
  0xb4   :  { %1274 = dma.done.wait [#allocation3], 16 }
  0xb5   :  { %1275 = vsyncadd [#allocation3], 4294967280  ;;  %s1169_s4 = sld [smem:[#allocation5 + $0xc]] }
  0xbb   :  { %p650_p1 = scmp.gt.s32.totalorder %s1169_s4, 0  ;;  %p1170_p2 = scmp.lt.s32.totalorder %s1169_s4, 63 }
  0xbd   :  { %s1420_s4 = smov (!%p650_p1, %s1169_s4), 0 }
  0xbe   :  { %s1422_s4 = smov (!%p1170_p2, %s1420_s4), 63 }
  0xbf   :  { %s654_s7 = scalar_lea.vmem %s1369_s1, %s1422_s4 }
  0xc0   :  { %v673_v12 = vld [vmem:[%s654_s7] sm:$0x1] }
  0xc1   :  { %674 = vst [vmem:[#allocation2 + $0xc] sm:$0x1] %v673_v12 }
  0xc2   :  { %699 = vsyncadd [#allocation3], 16 }
  0xc3   :  { %1276 = dma.done.wait [#allocation3], 16 }
  0xc4   :  { %1277 = vsyncadd [#allocation3], 4294967280  ;;  %s1175_s8 = sld [smem:[#allocation5 + $0xd]] }
  0xca   :  { %p704_p3 = scmp.gt.s32.totalorder %s1175_s8, 0  ;;  %p1176_p4 = scmp.lt.s32.totalorder %s1175_s8, 63 }
  0xcc   :  { %s1424_s8 = smov (!%p704_p3, %s1175_s8), 0 }
  0xcd   :  { %s1426_s8 = smov (!%p1176_p4, %s1424_s8), 63 }
  0xce   :  { %s708_s11 = scalar_lea.vmem %s1369_s1, %s1426_s8 }
  0xcf   :  { %v727_v13 = vld [vmem:[%s708_s11] sm:$0x1] }
  0xd0   :  { %728 = vst [vmem:[#allocation2 + $0xd] sm:$0x1] %v727_v13 }
  0xd1   :  { %753 = vsyncadd [#allocation3], 16 }
  0xd2   :  { %1278 = dma.done.wait [#allocation3], 16 }
  0xd3   :  { %1279 = vsyncadd [#allocation3], 4294967280  ;;  %s1181_s12 = sld [smem:[#allocation5 + $0xe]] }
  0xd9   :  { %p758_p5 = scmp.gt.s32.totalorder %s1181_s12, 0  ;;  %p1182_p6 = scmp.lt.s32.totalorder %s1181_s12, 63 }
  0xdb   :  { %s1428_s12 = smov (!%p758_p5, %s1181_s12), 0 }
  0xdc   :  { %s1430_s12 = smov (!%p1182_p6, %s1428_s12), 63 }
  0xdd   :  { %s762_s0 = scalar_lea.vmem %s1369_s1, %s1430_s12 }
  0xde   :  { %v781_v14 = vld [vmem:[%s762_s0] sm:$0x1] }
  0xdf   :  { %782 = vst [vmem:[#allocation2 + $0xe] sm:$0x1] %v781_v14 }
  0xe0   :  { %807 = vsyncadd [#allocation3], 16 }
  0xe1   :  { %1280 = dma.done.wait [#allocation3], 16 }
  0xe2   :  { %1281 = vsyncadd [#allocation3], 4294967280  ;;  %s1187_s15 = sld [smem:[#allocation5 + $0xf]] }
  0xe8   :  { %p812_p7 = scmp.gt.s32.totalorder %s1187_s15, 0  ;;  %p1188_p8 = scmp.lt.s32.totalorder %s1187_s15, 63 }
  0xea   :  { %s1432_s15 = smov (!%p812_p7, %s1187_s15), 0 }
  0xeb   :  { %s1434_s15 = smov (!%p1188_p8, %s1432_s15), 63 }
  0xec   :  { %s816_s18 = scalar_lea.vmem %s1369_s1, %s1434_s15 }
  0xed   :  { %v835_v15 = vld [vmem:[%s816_s18] sm:$0x1] }
  0xee   :  { %836 = vst [vmem:[#allocation2 + $0xf] sm:$0x1] %v835_v15 }
  0xef   :  { %861 = vsyncadd [#allocation3], 16 }
  0xf0   :  { %1282 = dma.done.wait [#allocation3], 128 }
  0xf1   :  { %1283 = vsyncadd [#allocation3], 4294967168  ;;  %s1287_s19 = smov [#allocation6]   ;;  %v878_v16 = vld [vmem:[#allocation2] sm:$0xff]  ;;  %vm882_vm0 = vcmask 261120  }
  0xf2   :  { %s890_s20 = sshll.u32 %s1287_s19, 4  ;;  %v880_v18 = vmul.f32 5.656854, %v878_v16  ;;  %s891_s20 = int_to_ptr.vmem [resolvable:$true] %s890_s20 }
  0xf3   :  { %s1242_s21 = scalar_lea.vmem %s891_s20, 256  ;;  %p1247_p10 = scmp.lt.s32.totalorder %s891_s20, %s891_s20 }
  0xf4   :  { %883 = vst.msk [vmem:[#allocation6] sm:$0xff] %vm882_vm0, %v880_v18  ;;  %p1243_p9 = scmp.ne.s32.totalorder %s891_s20, %s1242_s21  ;;  %p1248_p11 = scmp.lt.s32.totalorder %s1242_s21, %s1242_s21 }
  0xf5   :  { %v879_v17 = vld [vmem:[#allocation2 + $0x8] sm:$0xff] }
  0xf6   :  { %v881_v19 = vmul.f32 5.656854, %v879_v17  ;;  %p1249_p12 = por %p1248_p11, %p1247_p10 }
  0xf8   :  { %884 = vst.msk [vmem:[#allocation6 + $0x8] sm:$0xff] %vm882_vm0, %v881_v19  ;;  %p1250_p13 = pnand %p1249_p12, %p1243_p9 }
  0xfa   :  { %1253 = shalt.err (!%p1250_p13)
}
  0xfb   :  { %s1254_s23 = scalar_lea.hbm %s1370_s2, 256 }
  0xfc   :  { %p1255_p0 = scmp.ne.s32.totalorder %s1370_s2, %s1254_s23  ;;  %p1258_p1 = scmp.lt.u32.totalorder %s1254_s23, %s1370_s2 }
  0xfe   :  { %p1260_p2 = pnand %p1258_p1, %p1255_p0 }
 0x100   :  { %1263 = shalt.err (!%p1260_p2)
}
 0x101   :  { %s1288_s28 = smov 128   ;;  %s1289_s29 = smov 8  }
 0x102   :  { %896 = dma.vmem_to_hbm [thread:$0]  %s891_s20, 256, %s1370_s2, [#allocation7], %s1288_s28, %s1288_s28, %s1289_s29  }
 0x103   :  { %1284 = dma.done.wait [#allocation7], 256  }
 0x104   :  { %1285 = vsyncadd [#allocation7], 4294967040 }
 0x105   :  { %900 = vsyncpa [#allocation7], 1 }
 0x106   :  { %901 = vsyncmov [#allocation3] }
 0x109   :  { %s902_s4 = vpop.sfrf %901 }
 0x10a   :  { %p1193_p3 = scmp.ne.s32.totalorder %s902_s4, 0 }
 0x10c   :  { %906 = shalt.err (%p1193_p3)  }

</bundles_post_ra>
